<compile_context>
chip_gen: v7x
topology: tpu7x:2x2x1
jax: 0.10.0
libtpu: 0.0.40
codegen_flags: <defaults>
</compile_context>

<pallas_src>
import math

import jax
import jax.numpy as jnp
from jax.experimental import pallas as pl
from jax.experimental.pallas import tpu as pltpu


def ffn_kernel(x_ref, w1_ref, b1_ref, w2_ref, b2_ref, o_ref):
    """out = relu(x @ W1 + b1) @ W2 + b2 -- one shot, everything in VMEM."""
    x = x_ref[...]                                                    # (N, d_model)
    h = jnp.dot(x, w1_ref[...],
                preferred_element_type=jnp.float32,
                precision=jax.lax.Precision.HIGHEST) + b1_ref[...]    # (N, d_ff)
    h = jnp.maximum(h, 0.0)                                           # ReLU (VPU)
    y = jnp.dot(h, w2_ref[...],
                preferred_element_type=jnp.float32,
                precision=jax.lax.Precision.HIGHEST) + b2_ref[...]    # (N, d_model)
    o_ref[...] = y.astype(o_ref.dtype)


def feed_forward(x, w1, b1, w2, b2):
    """x: (B, S, d_model); w1: (d_model, d_ff); w2: (d_ff, d_model).
    Weights are stored pre-transposed ([D_in, D_out]) so the kernel computes
    x @ W + b; biases are stored 2-D as (1, d_ff) / (1, d_model)."""
    B, S, D = x.shape
    N = B * S
    x2d = x.reshape(N, D)   # flatten batch*seq onto the sublane axis (free in HBM)

    vmem = pl.BlockSpec(memory_space=pltpu.MemorySpace.VMEM)
    out = pl.pallas_call(
        ffn_kernel,
        out_shape=jax.ShapeDtypeStruct((N, D), jnp.float32),
        in_specs=[vmem, vmem, vmem, vmem, vmem],
        out_specs=vmem,
    )(x2d, w1, b1, w2, b2)
    return out.reshape(B, S, D)


def reference_ffn(x, w1, b1, w2, b2):
    """Plain-JAX reference mirroring the PyTorch forward (in f32)."""
    h = jnp.maximum(
        jnp.einsum('bsd,df->bsf', x, w1,
                   precision=jax.lax.Precision.HIGHEST) + b1[0], 0.0)
    return jnp.einsum('bsf,fd->bsd', h, w2,
                      precision=jax.lax.Precision.HIGHEST) + b2[0]


if __name__ == "__main__":
    B, S, D_MODEL, D_FF = 2, 8, 32, 128

    key = jax.random.PRNGKey(0)
    k_w1, k_b1, k_w2, k_b2, k_x = jax.random.split(key, 5)

    # nn.Linear default init: U(-1/sqrt(fan_in), 1/sqrt(fan_in)).
    s1 = 1.0 / math.sqrt(D_MODEL)
    s2 = 1.0 / math.sqrt(D_FF)
    w1 = jax.random.uniform(k_w1, (D_MODEL, D_FF), jnp.float32, -s1, s1)
    b1 = jax.random.uniform(k_b1, (1, D_FF), jnp.float32, -s1, s1)
    w2 = jax.random.uniform(k_w2, (D_FF, D_MODEL), jnp.float32, -s2, s2)
    b2 = jax.random.uniform(k_b2, (1, D_MODEL), jnp.float32, -s2, s2)

    x = jax.random.normal(k_x, (B, S, D_MODEL), jnp.float32)

    out = feed_forward(x, w1, b1, w2, b2)
    out = jax.block_until_ready(out)

    ref = reference_ffn(x, w1, b1, w2, b2)
    assert out.shape == (B, S, D_MODEL)
    assert jnp.allclose(out, ref, atol=1e-4, rtol=1e-4), "mismatch vs reference"

    print("KERNEL_OK")
</pallas_src>

<mosaic_0001>
module attributes {stable_mosaic.version = 11 : i64} {
  func.func @ffn_kernel(%arg0: memref<16x32xf32, #tpu.memory_space<vmem>>, %arg1: memref<32x128xf32, #tpu.memory_space<vmem>>, %arg2: memref<1x128xf32, #tpu.memory_space<vmem>>, %arg3: memref<128x32xf32, #tpu.memory_space<vmem>>, %arg4: memref<1x32xf32, #tpu.memory_space<vmem>>, %arg5: memref<16x32xf32, #tpu.memory_space<vmem>>) attributes {dimension_semantics = [], scalar_prefetch = 0 : i64, scratch_operands = 0 : i64, tpu.core_type = #tpu.core_type<tc>} {
    %c0 = arith.constant 0 : index
    %c0_0 = arith.constant 0 : index
    %0 = vector.load %arg0[%c0, %c0_0] : memref<16x32xf32, #tpu.memory_space<vmem>>, vector<16x32xf32>
    %c0_1 = arith.constant 0 : index
    %c0_2 = arith.constant 0 : index
    %1 = vector.load %arg1[%c0_1, %c0_2] : memref<32x128xf32, #tpu.memory_space<vmem>>, vector<32x128xf32>
    %cst = arith.constant dense<0.000000e+00> : vector<16x128xf32>
    %2 = tpu.matmul %0, %1, %cst {dimension_numbers = #tpu.dot_dimension_numbers<[1], [0], [0], [1], [0, 0, 1, 1], [], []>, precision = #tpu.contract_precision<fp32>} : vector<16x32xf32>, vector<32x128xf32>, vector<16x128xf32> -> vector<16x128xf32>
    %c0_3 = arith.constant 0 : index
    %c0_4 = arith.constant 0 : index
    %3 = vector.load %arg2[%c0_3, %c0_4] : memref<1x128xf32, #tpu.memory_space<vmem>>, vector<1x128xf32>
    %4 = vector.broadcast %3 : vector<1x128xf32> to vector<16x128xf32>
    %5 = arith.addf %2, %4 : vector<16x128xf32>
    %cst_5 = arith.constant 0.000000e+00 : f32
    %6 = vector.broadcast %cst_5 : f32 to vector<16x128xf32>
    %7 = arith.maximumf %5, %6 : vector<16x128xf32>
    %c0_6 = arith.constant 0 : index
    %c0_7 = arith.constant 0 : index
    %8 = vector.load %arg3[%c0_6, %c0_7] : memref<128x32xf32, #tpu.memory_space<vmem>>, vector<128x32xf32>
    %cst_8 = arith.constant dense<0.000000e+00> : vector<16x32xf32>
    %9 = tpu.matmul %7, %8, %cst_8 {dimension_numbers = #tpu.dot_dimension_numbers<[1], [0], [0], [1], [0, 0, 1, 1], [], []>, precision = #tpu.contract_precision<fp32>} : vector<16x128xf32>, vector<128x32xf32>, vector<16x32xf32> -> vector<16x32xf32>
    %c0_9 = arith.constant 0 : index
    %c0_10 = arith.constant 0 : index
    %10 = vector.load %arg4[%c0_9, %c0_10] : memref<1x32xf32, #tpu.memory_space<vmem>>, vector<1x32xf32>
    %11 = vector.broadcast %10 : vector<1x32xf32> to vector<16x32xf32>
    %12 = arith.addf %9, %11 : vector<16x32xf32>
    %c0_11 = arith.constant 0 : index
    %c0_12 = arith.constant 0 : index
    %13 = vector.load %arg5[%c0_11, %c0_12] : memref<16x32xf32, #tpu.memory_space<vmem>>, vector<16x32xf32>
    tpu.vector_store %arg5[%c0_11, %c0_12], %12 {strides = array<i32>} : memref<16x32xf32, #tpu.memory_space<vmem>>, vector<16x32xf32>,
    return
  }
}

</mosaic_0001>

<bundles_post_ra>
// kernel: tpu_custom_call.1
= control target key start
LH: loop header
LB: loop body
LE: loop exit
PB: predicated region body
PF: predicated region fallthrough
CT: control target
= control target key end

     0   :  { %vm34_vm0 = vcmask 261120   ;;  %s2485_s0 = inlined_call_operand.vmem [shape: f32[16,32], index: 0, kind: input, shape index: {}]   ;;  %s2486_s1 = inlined_call_operand.vmem [shape: f32[32,128], index: 1, kind: input, shape index: {}]   ;;  %s2487_s2 = inlined_call_operand.vmem [shape: f32[1,128], index: 2, kind: input, shape index: {}]   ;;  %s2488_s3 = inlined_call_operand.vmem [shape: f32[128,32], index: 3, kind: input, shape index: {}]   ;;  %s2489_s4 = inlined_call_operand.vmem [shape: f32[1,32], index: 4, kind: input, shape index: {}]   ;;  %s2490_s5 = inlined_call_operand.hbm [shape: f32[16,32], index: 5, kind: output, shape index: {}]  }
   0x1   :  { %v23_v0 = vld [vmem:[%s2486_s1] sm:$0xff]  ;;  %v24_v1 = vld [vmem:[%s2486_s1 + $0x8] sm:$0xff]  ;;  %v25_v2 = vld [vmem:[%s2486_s1 + $0x10] sm:$0xff] }
   0x2   :  { %v42_v3 = vand.u32 4294901760, %v23_v0  ;;  %v45_v4 = vand.u32 4294901760, %v24_v1  ;;  %v26_v5 = vld [vmem:[%s2486_s1 + $0x18] sm:$0xff]  ;;  %v48_v6 = vand.u32 4294901760, %v25_v2  ;;  %v21_v7 = vld [vmem:[%s2485_s0] sm:$0xff]  ;;  %v22_v8 = vld [vmem:[%s2485_s0 + $0x8] sm:$0xff] }
   0x3   :  { %v51_v9 = vand.u32 4294901760, %v26_v5  ;;  %v36_v10 = vsel %vm34_vm0, %v21_v7, 0  ;;  %v39_v11 = vsel %vm34_vm0, %v22_v8, 0  ;;  %v2081_v20 = vld [vmem:[%s2488_s3] sm:$0xff]  ;;  %v2104_v30 = vld [vmem:[%s2488_s3 + $0x8] sm:$0xff] }
   0x4   :  { %v2062_v12 = vpack.c.bf16 %v45_v4, %v42_v3  ;;  %v2064_v13 = vand.u32 4294901760, %v36_v10  ;;  %v2066_v14 = vand.u32 4294901760, %v39_v11  ;;  %v2068_v15 = vsub.f32 %v23_v0, %v42_v3 }
   0x5   :  { %v2070_v16 = vpack.c.bf16 %v51_v9, %v48_v6  ;;  %v2072_v17 = vsub.f32 %v24_v1, %v45_v4  ;;  %v2074_v18 = vsub.f32 %v25_v2, %v48_v6  ;;  %v2076_v19 = vsub.f32 %v26_v5, %v51_v9 }
   0x6   :  { %1719 = vmatprep.subr.bf16.mxu0 %v2062_v12  ;;  %v2085_v21 = vsub.f32 %v36_v10, %v2064_v13  ;;  %v2088_v22 = vsub.f32 %v39_v11, %v2066_v14  ;;  %v133_v23 = vand.u32 4294901760, %v2068_v15  ;;  %v595_v31 = vand.u32 4294901760, %v2081_v20 }
   0x7   :  { %1721 = vmatpush3.bf16.msra.mxu0 %v2062_v12  ;;  %v140_v24 = vand.u32 4294901760, %v2072_v17  ;;  %v147_v25 = vand.u32 4294901760, %v2074_v18  ;;  %v154_v26 = vand.u32 4294901760, %v2076_v19 }
   0x8   :  { %1723 = vmatprep.subr.bf16.mxu0 %v2070_v16  ;;  %v112_v27 = vand.u32 4294901760, %v2085_v21  ;;  %v122_v28 = vand.u32 4294901760, %v2088_v22  ;;  %v134_v29 = vsub.f32 %v2068_v15, %v133_v23 }
   0x9   :  { %10 = vsyncpa [#allocation3], 0  ;;  %v141_v32 = vsub.f32 %v2072_v17, %v140_v24  ;;  %v148_v33 = vsub.f32 %v2074_v18, %v147_v25  ;;  %v155_v34 = vsub.f32 %v2076_v19, %v154_v26  ;;  %v2119_v35 = vld [vmem:[%s2488_s3 + $0x10] sm:$0xff]  ;;  %v2130_v39 = vld [vmem:[%s2488_s3 + $0x18] sm:$0xff]  ;;  %v598_v43 = vand.u32 4294901760, %v2104_v30  ;;  %s2009_s10 = smov [#allocation2]  }
   0xa   :  { %v113_v36 = vsub.f32 %v2085_v21, %v112_v27  ;;  %v123_v37 = vsub.f32 %v2088_v22, %v122_v28  ;;  %v135_v38 = vand.u32 4294901760, %v134_v29  ;;  %v2137_v44 = vld [vmem:[%s2488_s3 + $0x20] sm:$0xff]  ;;  %v2142_v45 = vld [vmem:[%s2488_s3 + $0x28] sm:$0xff]  ;;  %v2147_v48 = vsub.f32 %v2081_v20, %v595_v31  ;;  %v2153_v50 = vld [vmem:[%s2488_s3 + $0x30] sm:$0xff]  ;;  %s1285_s11 = sshll.u32 %s2009_s10, 4  ;;  %s1286_s11 = int_to_ptr.vmem [resolvable:$true] %s1285_s11 }
   0xb   :  { %1725 = vmatpush3.bf16.msra.mxu0 %v2070_v16  ;;  %v142_v40 = vand.u32 4294901760, %v141_v32  ;;  %v149_v41 = vand.u32 4294901760, %v148_v33  ;;  %v156_v42 = vand.u32 4294901760, %v155_v34  ;;  %v601_v49 = vand.u32 4294901760, %v2119_v35  ;;  %v2158_v51 = vld [vmem:[%s2488_s3 + $0x38] sm:$0xff]  ;;  %v2180_v62 = vld [vmem:[%s2488_s3 + $0x40] sm:$0xff]  ;;  %p1990_p1 = scmp.lt.s32.totalorder %s1286_s11, %s1286_s11 }
   0xc   :  { %v114_v46 = vand.u32 4294901760, %v113_v36  ;;  %v124_v47 = vand.u32 4294901760, %v123_v37  ;;  %v2163_v54 = vsub.f32 %v2104_v30, %v598_v43  ;;  %v604_v55 = vand.u32 4294901760, %v2130_v39  ;;  %v2191_v0 = vld [vmem:[%s2488_s3 + $0x48] sm:$0xff]  ;;  %v2224_v10 = vld [vmem:[%s2488_s3 + $0x50] sm:$0xff]  ;;  %v582_v11 = vld [vmem:[%s2488_s3 + $0x58] sm:$0xff] }
   0xd   :  { %v1726_v52 = vpack.c.bf16 %v142_v40, %v135_v38  ;;  %v1730_v53 = vpack.c.bf16 %v156_v42, %v149_v41  ;;  %v2169_v56 = vsub.f32 %v2119_v35, %v601_v49  ;;  %v607_v57 = vand.u32 4294901760, %v2137_v44  ;;  %s1985_s12 = scalar_lea.vmem %s1286_s11, 256 }
   0xe   :  { %1450 = vmatprep.mubr.f32.mxu0 %v114_v46  ;;  %v610_v58 = vand.u32 4294901760, %v2142_v45  ;;  %v1830_v59 = vpack.c.bf16 %v2163_v54, %v2147_v48  ;;  %v613_v60 = vand.u32 4294901760, %v2153_v50  ;;  %v616_v61 = vand.u32 4294901760, %v2158_v51  ;;  %p1986_p0 = scmp.ne.s32.totalorder %s1286_s11, %s1985_s12  ;;  %p1991_p2 = scmp.lt.s32.totalorder %s1985_s12, %s1985_s12 }
   0xf   :  { %1451 = vmatmul.mubr.f32.vlgmr.msra.gmra.mrb[0].mxu0 %v124_v47  ;;  %1727 = vmatprep.subr.bf16.mxu0 %v1726_v52  ;;  %v2186_v63 = vsub.f32 %v2130_v39, %v604_v55  ;;  %v1734_v1 = vpack.c.bf16 %v2072_v17, %v2068_v15  ;;  %v2198_v2 = vsub.f32 %v2137_v44, %v607_v57  ;;  %v619_v5 = vand.u32 4294901760, %v2180_v62 }
  0x10   :  { %1729 = vmatpush3.bf16.msra.mxu0 %v1726_v52  ;;  %1461 = vmatprep.mubr.f32.mxu0 %v2064_v13  ;;  %v2203_v3 = vsub.f32 %v2142_v45, %v610_v58  ;;  %v2213_v7 = vsub.f32 %v2153_v50, %v613_v60  ;;  %v2218_v8 = vsub.f32 %v2158_v51, %v616_v61  ;;  %v622_v9 = vand.u32 4294901760, %v2191_v0  ;;  %p1992_p3 = por %p1991_p2, %p1990_p1 }
  0x11   :  { %1731 = vmatprep.subr.bf16.mxu0 %v1730_v53  ;;  %1831 = vmatprep.subr.bf16.mxu1 %v1830_v59  ;;  %v1834_v4 = vpack.c.bf16 %v2186_v63, %v2169_v56  ;;  %v1738_v29 = vpack.c.bf16 %v2076_v19, %v2074_v18  ;;  %v625_v32 = vand.u32 4294901760, %v2224_v10  ;;  %v2238_v34 = vsub.f32 %v2180_v62, %v619_v5  ;;  %v583_v18 = vld [vmem:[%s2488_s3 + $0x60] sm:$0xff]  ;;  %v584_v19 = vld [vmem:[%s2488_s3 + $0x68] sm:$0xff] }
  0x12   :  { %1833 = vmatpush3.bf16.msra.mxu1 %v1830_v59  ;;  %v1838_v6 = vpack.c.bf16 %v2203_v3, %v2198_v2  ;;  %v1842_v33 = vpack.c.bf16 %v2218_v8, %v2213_v7  ;;  %v2241_v36 = vsub.f32 %v2191_v0, %v622_v9  ;;  %v628_v37 = vand.u32 4294901760, %v582_v11  ;;  %p1993_p4 = pnand %p1992_p3, %p1986_p0 }
  0x13   :  { %1835 = vmatprep.subr.bf16.mxu1 %v1834_v4  ;;  %v2247_v40 = vsub.f32 %v2224_v10, %v625_v32  ;;  %v1750_v46 = vpack.c.bf16 %v140_v24, %v133_v23  ;;  %v1754_v47 = vpack.c.bf16 %v154_v26, %v147_v25  ;;  %v2280_v15 = vpack.c.bf16 %v598_v43, %v595_v31  ;;  %v585_v24 = vld [vmem:[%s2488_s3 + $0x70] sm:$0xff]  ;;  %v586_v25 = vld [vmem:[%s2488_s3 + $0x78] sm:$0xff] }
  0x14   :  { %1733 = vmatpush3.bf16.msra.mxu0 %v1730_v53  ;;  %v1846_v38 = vpack.c.bf16 %v2241_v36, %v2238_v34  ;;  %v2249_v41 = vsub.f32 %v582_v11, %v628_v37  ;;  %v2287_v17 = vpack.c.bf16 %v604_v55, %v601_v49  ;;  %v631_v20 = vand.u32 4294901760, %v583_v18 }
  0x15   :  { %1735 = vmatprep.subr.bf16.mxu0 %v1734_v1  ;;  %v698_v43 = vand.u32 4294901760, %v2147_v48  ;;  %v705_v44 = vand.u32 4294901760, %v2163_v54 }
  0x16   :  { %1837 = vmatpush3.bf16.msra.mxu1 %v1834_v4  ;;  %v1850_v42 = vpack.c.bf16 %v2249_v41, %v2247_v40 }
  0x17   :  { %1462 = vmatmul.mubr.f32.vlgmr.msra.gmra.mrb[0].mxu0 %v2066_v14  ;;  %1839 = vmatprep.subr.bf16.mxu1 %v1838_v6  ;;  %v699_v49 = vsub.f32 %v2147_v48, %v698_v43  ;;  %v706_v50 = vsub.f32 %v2163_v54, %v705_v44  ;;  %v2350_v4 = vpack.c.bf16 %v705_v44, %v698_v43  ;;  %v747_v43 = vand.u32 4294901760, %v2218_v8 }
  0x18   :  { %1737 = vmatpush3.bf16.msra.mxu0 %v1734_v1  ;;  %1472 = vmatprep.mubr.f32.mxu0 %v2085_v21  ;;  %v634_v21 = vand.u32 4294901760, %v584_v19 }
  0x19   :  { %1739 = vmatprep.subr.bf16.mxu0 %v1738_v29  ;;  %v700_v51 = vand.u32 4294901760, %v699_v49  ;;  %v707_v52 = vand.u32 4294901760, %v706_v50 }
  0x1a   :  { %1841 = vmatpush3.bf16.msra.mxu1 %v1838_v6  ;;  %v788_v23 = vsub.f32 %v584_v19, %v634_v21  ;;  %v2332_v39 = vpack.c.bf16 %v634_v21, %v631_v20 }
  0x1b   :  { %1843 = vmatprep.subr.bf16.mxu1 %v1842_v33  ;;  %v2345_v53 = vpack.c.bf16 %v707_v52, %v700_v51 }
  0x1c   :  { %1741 = vmatpush3.bf16.msra.mxu0 %v1738_v29  ;;  %v1296_v29 = vld [vmem:[%s2487_s2] ss:$0 sm:$0xff] }
  0x1d   :  { %1743 = vmatprep.subr.bf16.mxu0 %v2062_v12 }
  0x1e   :  { %1845 = vmatpush3.bf16.msra.mxu1 %v1842_v33 }
  0x1f   :  { %1473 = vmatmul.mubr.f32.vlgmr.msra.gmra.mrb[0].mxu0 %v2088_v22  ;;  %1847 = vmatprep.subr.bf16.mxu1 %v1846_v38  ;;  %v781_v22 = vsub.f32 %v583_v18, %v631_v20  ;;  %v726_v20 = vand.u32 4294901760, %v2198_v2 }
  0x20   :  { %1745 = vmatpush3.bf16.msra.mxu0 %v2062_v12  ;;  %1483 = vmatprep.mubr.f32.mxu0 %v112_v27  ;;  %v637_v27 = vand.u32 4294901760, %v585_v24 }
  0x21   :  { %1747 = vmatprep.subr.bf16.mxu0 %v2070_v16  ;;  %v1854_v26 = vpack.c.bf16 %v788_v23, %v781_v22  ;;  %v782_v55 = vand.u32 4294901760, %v781_v22 }
  0x22   :  { %1849 = vmatpush3.bf16.msra.mxu1 %v1846_v38  ;;  %v795_v30 = vsub.f32 %v585_v24, %v637_v27 }
  0x23   :  { %1851 = vmatprep.subr.bf16.mxu1 %v1850_v42 }
  0x24   :  { %1749 = vmatpush3.bf16.msra.mxu0 %v2070_v16  ;;  %v796_v62 = vand.u32 4294901760, %v795_v30 }
  0x25   :  { %1751 = vmatprep.subr.bf16.mxu0 %v1750_v46 }
  0x26   :  { %1853 = vmatpush3.bf16.msra.mxu1 %v1850_v42  ;;  %v797_v54 = vsub.f32 %v795_v30, %v796_v62 }
  0x27   :  { %1484 = vmatmul.mubr.f32.vlgmr.msra.gmra.mrb[0].mxu0 %v122_v28  ;;  %v640_v28 = vand.u32 4294901760, %v586_v25  ;;  %1855 = vmatprep.subr.bf16.mxu1 %v1854_v26 }
  0x28   :  { %1753 = vmatpush3.bf16.msra.mxu0 %v1750_v46  ;;  %1494 = vmatprep.mubr.f32.mxu0 %v2064_v13  ;;  %v712_v46 = vand.u32 4294901760, %v2169_v56 }
  0x29   :  { %1755 = vmatprep.subr.bf16.mxu0 %v1754_v47  ;;  %v802_v31 = vsub.f32 %v586_v25, %v640_v28  ;;  %v2339_v45 = vpack.c.bf16 %v640_v28, %v637_v27  ;;  %v727_v28 = vsub.f32 %v2198_v2, %v726_v20 }
  0x2a   :  { %1857 = vmatpush3.bf16.msra.mxu1 %v1854_v26  ;;  %v713_v24 = vsub.f32 %v2169_v56, %v712_v46 }
  0x2b   :  { %v1858_v35 = vpack.c.bf16 %v802_v31, %v795_v30  ;;  %v803_v48 = vand.u32 4294901760, %v802_v31  ;;  %v728_v52 = vand.u32 4294901760, %v727_v28 }
  0x2c   :  { %1757 = vmatpush3.bf16.msra.mxu0 %v1754_v47  ;;  %v719_v47 = vand.u32 4294901760, %v2186_v63  ;;  %v714_v49 = vand.u32 4294901760, %v713_v24 }
  0x2d   :  { %1759 = vmatprep.subr.bf16.mxu0 %v2062_v12  ;;  %1859 = vmatprep.subr.bf16.mxu1 %v1858_v35  ;;  %v804_v1 = vsub.f32 %v802_v31, %v803_v48  ;;  %v2356_v11 = vpack.c.bf16 %v803_v48, %v796_v62  ;;  %v754_v62 = vand.u32 4294901760, %v2238_v34  ;;  %v761_v48 = vand.u32 4294901760, %v2241_v36 }
  0x2e   :  { %1861 = vmatpush3.bf16.msra.mxu1 %v1858_v35  ;;  %v720_v25 = vsub.f32 %v2186_v63, %v719_v47  ;;  %v740_v35 = vand.u32 4294901760, %v2213_v7 }
  0x2f   :  { %1495 = vmatmul.mubr.f32.vlgmr.msra.gmra.mrb[0].mxu0 %v2066_v14  ;;  %1863 = vmatprep.subr.bf16.mxu1 %v2280_v15  ;;  %v805_v6 = vand.u32 4294901760, %v804_v1 }
  0x30   :  { %1761 = vmatpush3.bf16.msra.mxu0 %v2062_v12  ;;  %1505 = vmatprep.mubr.f32.mxu0 %v2064_v13  ;;  %v2296_v12 = vpack.c.bf16 %v610_v58, %v607_v57  ;;  %v2304_v13 = vpack.c.bf16 %v616_v61, %v613_v60  ;;  %v789_v57 = vand.u32 4294901760, %v788_v23  ;;  %v783_v58 = vsub.f32 %v781_v22, %v782_v55 }
  0x31   :  { %1763 = vmatprep.subr.bf16.mxu0 %v2070_v16  ;;  %v733_v22 = vand.u32 4294901760, %v2203_v3  ;;  %v721_v50 = vand.u32 4294901760, %v720_v25  ;;  %v1906_v63 = vpack.c.bf16 %v747_v43, %v740_v35 }
  0x32   :  { %v790_v59 = vsub.f32 %v788_v23, %v789_v57  ;;  %v784_v60 = vand.u32 4294901760, %v783_v58  ;;  %v2354_v10 = vpack.c.bf16 %v789_v57, %v782_v55  ;;  %v741_v58 = vsub.f32 %v2213_v7, %v740_v35 }
  0x33   :  { %v734_v31 = vsub.f32 %v2203_v3, %v733_v22  ;;  %v1902_v56 = vpack.c.bf16 %v733_v22, %v726_v20 }
  0x34   :  { %1765 = vmatpush3.bf16.msra.mxu0 %v2070_v16  ;;  %v2314_v16 = vpack.c.bf16 %v628_v37, %v625_v32  ;;  %v791_v61 = vand.u32 4294901760, %v790_v59  ;;  %v748_v59 = vsub.f32 %v2218_v8, %v747_v43  ;;  %v742_v1 = vand.u32 4294901760, %v741_v58  ;;  %v1297_v8 = vld [vmem:[%s2489_s4] ss:$0 sm:$0xff] }
  0x35   :  { %1767 = vmatprep.subr.bf16.mxu0 %v2280_v15  ;;  %v735_v57 = vand.u32 4294901760, %v734_v31 }
  0x36   :  { %v2348_v0 = vpack.c.bf16 %v791_v61, %v784_v60  ;;  %v1802_v61 = vpack.c.bf16 %v721_v50, %v714_v49 }
  0x37   :  { %1506 = vmatmul.mubr.f32.vlgmr.msra.gmra.mrb[0].mxu0 %v2066_v14  ;;  %v2310_v14 = vpack.c.bf16 %v622_v9, %v619_v5  ;;  %v798_v5 = vand.u32 4294901760, %v797_v54  ;;  %v1806_v54 = vpack.c.bf16 %v735_v57, %v728_v52 }
  0x38   :  { %1769 = vmatpush3.bf16.msra.mxu0 %v2280_v15 }
  0x39   :  { %1771 = vmatprep.subr.bf16.mxu0 %v2287_v17  ;;  %v2352_v9 = vpack.c.bf16 %v805_v6, %v798_v5  ;;  %v749_v5 = vand.u32 4294901760, %v748_v59  ;;  %v755_v6 = vsub.f32 %v2238_v34, %v754_v62 }
  0x3c   :  { %1773 = vmatpush3.bf16.msra.mxu0 %v2287_v17 }
  0x3d   :  { %1775 = vmatprep.subr.bf16.mxu0 %v2296_v12 }
  0x40   :  { %1777 = vmatpush3.bf16.msra.mxu0 %v2296_v12 }
  0x41   :  { %1779 = vmatprep.subr.bf16.mxu0 %v2304_v13 }
  0x44   :  { %1781 = vmatpush3.bf16.msra.mxu0 %v2304_v13 }
  0x45   :  { %1783 = vmatprep.subr.bf16.mxu0 %v2310_v14 }
  0x48   :  { %1785 = vmatpush3.bf16.msra.mxu0 %v2310_v14 }
  0x49   :  { %1787 = vmatprep.subr.bf16.mxu0 %v2314_v16 }
  0x4c   :  { %1789 = vmatpush3.bf16.msra.mxu0 %v2314_v16 }
  0x4d   :  { %1791 = vmatprep.subr.bf16.mxu0 %v2332_v39 }
  0x50   :  { %1793 = vmatpush3.bf16.msra.mxu0 %v2332_v39 }
  0x51   :  { %1795 = vmatprep.subr.bf16.mxu0 %v2339_v45 }
  0x54   :  { %1797 = vmatpush3.bf16.msra.mxu0 %v2339_v45 }
  0x55   :  { %1799 = vmatprep.subr.bf16.mxu0 %v2345_v53 }
 0x10a   :  { %v1507_v32 = vpop.f32.mrb[0].mxu0 }
 0x10b   :  { %v1958_v33 = vadd.f32 %v1507_v32, %v1296_v29  ;;  %v559_v37 = vpop.f32.mrb[1].mxu0  ;;  %v768_v32 = vand.u32 4294901760, %v2247_v40 }
 0x10c   :  { %v1959_v38 = vadd.f32 %v1296_v29, %v559_v37  ;;  %v762_v29 = vsub.f32 %v2241_v36, %v761_v48  ;;  %v756_v37 = vand.u32 4294901760, %v755_v6 }
 0x10d   :  { %v570_v42 = vmax.f32 %v1958_v33, 0.0  ;;  %v775_v33 = vand.u32 4294901760, %v2249_v41 }
 0x10e   :  { %v569_v18 = vmax.f32 %v1959_v38, 0.0  ;;  %v763_v38 = vand.u32 4294901760, %v762_v29 }
 0x10f   :  { %v2363_v19 = vand.u32 4294901760, %v570_v42  ;;  %v1914_v2 = vpack.c.bf16 %v775_v33, %v768_v32 }
 0x110   :  { %v2366_v21 = vand.u32 4294901760, %v569_v18  ;;  %v1814_v34 = vpack.c.bf16 %v763_v38, %v756_v37 }
 0x111   :  { %v2370_v23 = vsub.f32 %v570_v42, %v2363_v19  ;;  %v769_v42 = vsub.f32 %v2247_v40, %v768_v32  ;;  %v1898_v40 = vpack.c.bf16 %v719_v47, %v712_v46 }
 0x112   :  { %v676_v26 = vsub.f32 %v569_v18, %v2366_v21  ;;  %v776_v18 = vsub.f32 %v2249_v41, %v775_v33  ;;  %v1910_v41 = vpack.c.bf16 %v761_v48, %v754_v62 }
 0x113   :  { %v687_v27 = vand.u32 4294901760, %v2370_v23  ;;  %v770_v36 = vand.u32 4294901760, %v769_v42 }
 0x114   :  { %1610 = vmatprep.mubr.f32.mxu1 %v676_v26  ;;  %v677_v30 = vand.u32 4294901760, %v676_v26  ;;  %v777_v24 = vand.u32 4294901760, %v776_v18 }
 0x115   :  { %v688_v44 = vsub.f32 %v2370_v23, %v687_v27  ;;  %1611 = vmatmul.mubr.f32.vlgmr.msra.gmra.mrb[0].mxu1 %v2370_v23 }
 0x116   :  { %1865 = vmatpush3.bf16.msra.mxu1 %v2280_v15  ;;  %1645 = vmatprep.mubr.f32.mxu1 %v677_v30  ;;  %v678_v51 = vsub.f32 %v676_v26, %v677_v30  ;;  %v1818_v25 = vpack.c.bf16 %v777_v24, %v770_v36 }
 0x117   :  { %1867 = vmatprep.subr.bf16.mxu1 %v2287_v17  ;;  %v689_v60 = vand.u32 4294901760, %v688_v44 }
 0x118   :  { %v679_v55 = vand.u32 4294901760, %v678_v51 }
 0x11a   :  { %1869 = vmatpush3.bf16.msra.mxu1 %v2287_v17  ;;  %1540 = vmatprep.mubr.f32.mxu0 %v679_v55 }
 0x11b   :  { %1541 = vmatmul.mubr.f32.vlgmr.msra.gmra.mrb[2].mxu0 %v689_v60  ;;  %1871 = vmatprep.subr.bf16.mxu1 %v2296_v12 }
 0x11c   :  { %1801 = vmatpush3.bf16.msra.mxu0 %v2345_v53  ;;  %1575 = vmatprep.mubr.f32.mxu0 %v2366_v21  ;;  %v1810_v53 = vpack.c.bf16 %v749_v5, %v742_v1 }
 0x11d   :  { %1803 = vmatprep.subr.bf16.mxu0 %v1802_v61 }
 0x11e   :  { %1873 = vmatpush3.bf16.msra.mxu1 %v2296_v12 }
 0x11f   :  { %1875 = vmatprep.subr.bf16.mxu1 %v2304_v13 }
 0x120   :  { %1805 = vmatpush3.bf16.msra.mxu0 %v1802_v61 }
 0x121   :  { %1807 = vmatprep.subr.bf16.mxu0 %v1806_v54 }
 0x122   :  { %1877 = vmatpush3.bf16.msra.mxu1 %v2304_v13 }
 0x123   :  { %1879 = vmatprep.subr.bf16.mxu1 %v2310_v14 }
 0x124   :  { %1809 = vmatpush3.bf16.msra.mxu0 %v1806_v54 }
 0x125   :  { %1811 = vmatprep.subr.bf16.mxu0 %v1810_v53 }
 0x126   :  { %1881 = vmatpush3.bf16.msra.mxu1 %v2310_v14 }
 0x127   :  { %1883 = vmatprep.subr.bf16.mxu1 %v2314_v16 }
 0x128   :  { %1813 = vmatpush3.bf16.msra.mxu0 %v1810_v53 }
 0x129   :  { %1815 = vmatprep.subr.bf16.mxu0 %v1814_v34 }
 0x12a   :  { %1885 = vmatpush3.bf16.msra.mxu1 %v2314_v16 }
 0x12b   :  { %1887 = vmatprep.subr.bf16.mxu1 %v2332_v39 }
 0x12c   :  { %1817 = vmatpush3.bf16.msra.mxu0 %v1814_v34 }
 0x12d   :  { %1819 = vmatprep.subr.bf16.mxu0 %v1818_v25 }
 0x12e   :  { %1889 = vmatpush3.bf16.msra.mxu1 %v2332_v39 }
 0x12f   :  { %1891 = vmatprep.subr.bf16.mxu1 %v2339_v45 }
 0x130   :  { %1821 = vmatpush3.bf16.msra.mxu0 %v1818_v25 }
 0x131   :  { %1823 = vmatprep.subr.bf16.mxu0 %v2348_v0 }
 0x132   :  { %1893 = vmatpush3.bf16.msra.mxu1 %v2339_v45 }
 0x133   :  { %1895 = vmatprep.subr.bf16.mxu1 %v2350_v4 }
 0x134   :  { %1825 = vmatpush3.bf16.msra.mxu0 %v2348_v0 }
 0x135   :  { %1646 = vmatmul.mubr.f32.vlgmr.msra.gmra.mrb[0].mxu1 %v687_v27  ;;  %1827 = vmatprep.subr.bf16.mxu0 %v2352_v9 }
 0x136   :  { %1897 = vmatpush3.bf16.msra.mxu1 %v2350_v4  ;;  %1680 = vmatprep.mubr.f32.mxu1 %v2366_v21 }
 0x137   :  { %1899 = vmatprep.subr.bf16.mxu1 %v1898_v40 }
 0x138   :  { %1829 = vmatpush3.bf16.msra.mxu0 %v2352_v9 }
 0x13a   :  { %1901 = vmatpush3.bf16.msra.mxu1 %v1898_v40 }
 0x13b   :  { %1576 = vmatmul.mubr.f32.vlgmr.msra.gmra.mrb[2].mxu0 %v2363_v19  ;;  %1903 = vmatprep.subr.bf16.mxu1 %v1902_v56 }
 0x13e   :  { %1905 = vmatpush3.bf16.msra.mxu1 %v1902_v56 }
 0x13f   :  { %1907 = vmatprep.subr.bf16.mxu1 %v1906_v63 }
 0x142   :  { %1909 = vmatpush3.bf16.msra.mxu1 %v1906_v63 }
 0x143   :  { %1911 = vmatprep.subr.bf16.mxu1 %v1910_v41 }
 0x146   :  { %1913 = vmatpush3.bf16.msra.mxu1 %v1910_v41 }
 0x147   :  { %1915 = vmatprep.subr.bf16.mxu1 %v1914_v2 }
 0x14a   :  { %1917 = vmatpush3.bf16.msra.mxu1 %v1914_v2 }
 0x14b   :  { %1919 = vmatprep.subr.bf16.mxu1 %v2354_v10 }
 0x14e   :  { %1921 = vmatpush3.bf16.msra.mxu1 %v2354_v10 }
 0x14f   :  { %1923 = vmatprep.subr.bf16.mxu1 %v2356_v11 }
 0x152   :  { %1925 = vmatpush3.bf16.msra.mxu1 %v2356_v11 }
 0x153   :  { %1927 = vmatprep.subr.bf16.mxu1 %v2280_v15 }
 0x155   :  { %1681 = vmatmul.mubr.f32.vlgmr.msra.gmra.mrb[0].mxu1 %v2363_v19 }
 0x156   :  { %1929 = vmatpush3.bf16.msra.mxu1 %v2280_v15  ;;  %1715 = vmatprep.mubr.f32.mxu1 %v2366_v21 }
 0x157   :  { %1931 = vmatprep.subr.bf16.mxu1 %v2287_v17 }
 0x15a   :  { %1933 = vmatpush3.bf16.msra.mxu1 %v2287_v17 }
 0x15b   :  { %1935 = vmatprep.subr.bf16.mxu1 %v2296_v12 }
 0x15e   :  { %1937 = vmatpush3.bf16.msra.mxu1 %v2296_v12 }
 0x15f   :  { %1939 = vmatprep.subr.bf16.mxu1 %v2304_v13 }
 0x162   :  { %1941 = vmatpush3.bf16.msra.mxu1 %v2304_v13 }
 0x163   :  { %1943 = vmatprep.subr.bf16.mxu1 %v2310_v14 }
 0x166   :  { %1945 = vmatpush3.bf16.msra.mxu1 %v2310_v14 }
 0x167   :  { %1947 = vmatprep.subr.bf16.mxu1 %v2314_v16 }
 0x16a   :  { %1949 = vmatpush3.bf16.msra.mxu1 %v2314_v16 }
 0x16b   :  { %1951 = vmatprep.subr.bf16.mxu1 %v2332_v39 }
 0x16e   :  { %1953 = vmatpush3.bf16.msra.mxu1 %v2332_v39 }
 0x16f   :  { %1955 = vmatprep.subr.bf16.mxu1 %v2339_v45 }
 0x172   :  { %1957 = vmatpush3.bf16.msra.mxu1 %v2339_v45 }
 0x175   :  { %1716 = vmatmul.mubr.f32.vlgmr.msra.gmra.mrb[0].mxu1 %v2363_v19 }
 0x20e   :  { %v1577_v3 = vpop.f32.mrb[2].mxu0 }
 0x20f   :  { %v842_v7 = vpop.f32.mrb[3].mxu0  ;;  %v1960_v15 = vadd.f32 %v1577_v3, %v1297_v8 }
 0x210   :  { %v1962_v17 = vadd.f32 %v1297_v8, %v842_v7 }
 0x248   :  { %v1717_v12 = vpop.f32.mrb[0].mxu1 }
 0x249   :  { %v1961_v13 = vadd.f32 %v1960_v15, %v1717_v12  ;;  %v1268_v14 = vpop.f32.mrb[1].mxu1 }
 0x24a   :  { %v1963_v16 = vadd.f32 %v1962_v17, %v1268_v14 }
 0x24b   :  { %1279 = vst.msk [vmem:[#allocation2 + $0x8] sm:$0xff] %vm34_vm0, %v1961_v13 }
 0x24c   :  { %1278 = vst.msk [vmem:[#allocation2] sm:$0xff] %vm34_vm0, %v1963_v16 }
 0x24d   :  { %1996 = shalt.err (!%p1993_p4)
}
 0x24e   :  { %s1997_s14 = scalar_lea.hbm %s2490_s5, 256 }
 0x24f   :  { %p1998_p5 = scmp.ne.s32.totalorder %s2490_s5, %s1997_s14  ;;  %p2001_p6 = scmp.lt.u32.totalorder %s1997_s14, %s2490_s5 }
 0x251   :  { %p2003_p7 = pnand %p2001_p6, %p1998_p5 }
 0x253   :  { %2006 = shalt.err (!%p2003_p7)
}
 0x254   :  { %s2010_s19 = smov 128   ;;  %s2011_s20 = smov 8  }
 0x255   :  { %1291 = dma.vmem_to_hbm [thread:$0]  %s1286_s11, 256, %s2490_s5, [#allocation3], %s2010_s19, %s2010_s19, %s2011_s20  }
 0x256   :  { %2007 = dma.done.wait [#allocation3], 256  }
 0x257   :  { %2008 = vsyncadd [#allocation3], 4294967040 }
 0x258   :  { %1295 = vsyncpa [#allocation3], 1 }

</bundles_post_ra>
